<compile_context>
chip_gen: v7x
topology: tpu7x:2x2x1
jax: 0.10.0
libtpu: 0.0.40
codegen_flags: <defaults>
</compile_context>

<pallas_src>
import functools

import jax
import jax.numpy as jnp
import numpy as np
from jax import lax
from jax.experimental import pallas as pl
from jax.experimental.pallas import tpu as pltpu


def _round_up(x, m):
    return ((x + m - 1) // m) * m


def _physical_vmem_bytes():
    try:
        info = pltpu.get_tpu_info()
        v = int(getattr(info, "vmem_capacity_bytes", 0) or 0)
        if v > 0:
            return v
    except Exception:
        pass
    return 64 << 20          # conservative (v7x per-TensorCore) fallback


def _vmem_limit_bytes(ti, tj, d):
    # double-buffered inputs + outputs + elementwise temporaries headroom
    need = 4 * (2 * (2 * ti * d + 3 * ti + 3 * tj)
                + 2 * (2 * ti * tj + ti)
                + 8 * ti * tj)
    cap = max((_physical_vmem_bytes() * 3) // 4, 16 << 20)
    return int(min(max(need, 32 << 20), cap))


# --------------------------- pass 1: pair tiles ----------------------------- #
def _pairs_kernel(feat_i_ref, feat_j_ref, f2_i_ref, f2_j_ref,
                  lbl_i_ref, lbl_j_ref, *rest, sigma, w_leak, needs_mask):
    """Grid = (i_tile, j_tile); i is 'parallel', j is the reduction axis.

    Outputs: w_diff tile cache [Ti,Tj], w tile cache [Ti,Tj],
             per-row partial sums of w_diff [Ti,1] (resident across j).
    """
    if needs_mask:
        vi_ref, vj_ref, wdiff_ref, w_ref, rowsum_ref = rest
    else:
        wdiff_ref, w_ref, rowsum_ref = rest
    j = pl.program_id(1)

    xi = feat_i_ref[...]                                  # [Ti, D]
    xj = feat_j_ref[...]                                  # [Tj, D]

    # pairwise feature distance: one MXU matmul + prehoisted squared norms
    gram = lax.dot_general(xi, xj, (((1,), (1,)), ((), ())),
                           preferred_element_type=jnp.float32)   # [Ti, Tj]
    d2 = f2_i_ref[...] + f2_j_ref[...] - 2.0 * gram
    f_dist = jnp.sqrt(jnp.maximum(d2, 0.0))

    # scalar-label distance: |yi - yj| (== sqrt(clamp((yi-yj)^2, 1e-12)))
    l_dist = jnp.maximum(jnp.abs(lbl_i_ref[...] - lbl_j_ref[...]), 1e-6)

    c = -0.5 / (sigma * sigma)                            # folded at trace time
    w = jnp.exp(c * (l_dist * l_dist)) + w_leak
    w_diff = w * jnp.abs(f_dist - l_dist)

    if needs_mask:
        # zero the padded rows/cols once; pass 2 then needs no masking at all
        w_diff = (w_diff * vi_ref[...]) * vj_ref[...]

    wdiff_ref[...] = w_diff
    w_ref[...] = w

    @pl.when(j == 0)
    def _():
        rowsum_ref[...] = jnp.zeros_like(rowsum_ref)

    rowsum_ref[...] = rowsum_ref[...] + jnp.sum(w_diff, axis=1, keepdims=True)


# ----------------------- pass 2: masked reductions -------------------------- #
def _mask_kernel(alpha_ref, wdiff_ref, w_ref, cnt_ref, num_ref, den_ref):
    """Grid = (i_tile, j_tile). alpha arrives via scalar prefetch (SMEM)."""
    j = pl.program_id(1)

    @pl.when(j == 0)
    def _():
        cnt_ref[...] = jnp.zeros_like(cnt_ref)
        num_ref[...] = jnp.zeros_like(num_ref)
        den_ref[...] = jnp.zeros_like(den_ref)

    wd = wdiff_ref[...]
    ww = w_ref[...]
    mf = (wd > alpha_ref[0]).astype(jnp.float32)          # one mask, reused
    cnt_ref[...] = cnt_ref[...] + jnp.sum(mf, axis=1, keepdims=True)
    num_ref[...] = num_ref[...] + jnp.sum(wd * mf, axis=1, keepdims=True)
    den_ref[...] = den_ref[...] + jnp.sum(ww * mf, axis=1, keepdims=True)


# ------------------------------- builder ------------------------------------ #
@functools.lru_cache(maxsize=None)
def _build_rml_call(n, d, sigma, w_leak, p, tile):
    n8 = _round_up(n, 8)
    if n8 <= max(tile, 8):
        ti = tj = n8                                      # single pair tile
    else:
        ti = tj = _round_up(tile, 128)                    # lane-aligned tiles
    n_pad = _round_up(n, ti)
    n_i = n_pad // ti
    n_j = n_pad // tj
    needs_mask = (n_pad != n)

    compiler_params = pltpu.CompilerParams(
        dimension_semantics=("parallel", "arbitrary"),
        vmem_limit_bytes=_vmem_limit_bytes(ti, tj, d))

    # ---------------- pass 1 call ----------------
    pairs_kernel = functools.partial(
        _pairs_kernel, sigma=float(sigma), w_leak=float(w_leak),
        needs_mask=needs_mask)

    in_specs = [
        pl.BlockSpec((ti, d), lambda i, j: (i, 0)),       # feature rows
        pl.BlockSpec((tj, d), lambda i, j: (j, 0)),       # feature cols
        pl.BlockSpec((ti, 1), lambda i, j: (i, 0)),       # |x_i|^2 column
        pl.BlockSpec((1, tj), lambda i, j: (0, j)),       # |x_j|^2 row
        pl.BlockSpec((ti, 1), lambda i, j: (i, 0)),       # label column
        pl.BlockSpec((1, tj), lambda i, j: (0, j)),       # label row
    ]
    if needs_mask:
        in_specs += [
            pl.BlockSpec((ti, 1), lambda i, j: (i, 0)),   # row validity
            pl.BlockSpec((1, tj), lambda i, j: (0, j)),   # col validity
        ]

    pairs_call = pl.pallas_call(
        pairs_kernel,
        out_shape=(jax.ShapeDtypeStruct((n_pad, n_pad), jnp.float32),  # w_diff
                   jax.ShapeDtypeStruct((n_pad, n_pad), jnp.float32),  # w
                   jax.ShapeDtypeStruct((n_pad, 1), jnp.float32)),     # row sums
        grid_spec=pltpu.PrefetchScalarGridSpec(
            num_scalar_prefetch=0,
            grid=(n_i, n_j),
            in_specs=in_specs,
            out_specs=[
                pl.BlockSpec((ti, tj), lambda i, j: (i, j)),
                pl.BlockSpec((ti, tj), lambda i, j: (i, j)),
                pl.BlockSpec((ti, 1), lambda i, j: (i, 0)),
            ]),
        compiler_params=compiler_params,
        cost_estimate=pl.CostEstimate(
            flops=int(2 * n_pad * n_pad * d + 16 * n_pad * n_pad),
            transcendentals=int(2 * n_pad * n_pad),
            bytes_accessed=int(4 * (n_i * n_j * (ti + tj) * d
                                    + 2 * n_pad * n_pad))),
    )

    # ---------------- pass 2 call ----------------
    mask_call = pl.pallas_call(
        _mask_kernel,
        out_shape=(jax.ShapeDtypeStruct((n_pad, 1), jnp.float32),   # count
                   jax.ShapeDtypeStruct((n_pad, 1), jnp.float32),   # sum w_diff
                   jax.ShapeDtypeStruct((n_pad, 1), jnp.float32)),  # sum w
        grid_spec=pltpu.PrefetchScalarGridSpec(
            num_scalar_prefetch=1,                        # alpha -> SMEM
            grid=(n_i, n_j),
            in_specs=[
                pl.BlockSpec((ti, tj), lambda i, j, a: (i, j)),
                pl.BlockSpec((ti, tj), lambda i, j, a: (i, j)),
            ],
            out_specs=[
                pl.BlockSpec((ti, 1), lambda i, j, a: (i, 0)),
                pl.BlockSpec((ti, 1), lambda i, j, a: (i, 0)),
                pl.BlockSpec((ti, 1), lambda i, j, a: (i, 0)),
            ]),
        compiler_params=compiler_params,
        cost_estimate=pl.CostEstimate(
            flops=int(8 * n_pad * n_pad),
            transcendentals=0,
            bytes_accessed=int(8 * n_pad * n_pad)),
    )

    inv_nn = 1.0 / float(n * n)
    pf = float(p)

    def run(state, feature, label):
        # state: f32[2] = [alpha_prev, has_prev]; feature f32[n,d]; label f32[n,1]
        f2 = jnp.sum(feature * feature, axis=1, keepdims=True)      # [n, 1]
        if n_pad != n:
            feat_p = jnp.zeros((n_pad, d), jnp.float32).at[:n].set(feature)
            f2_c = jnp.zeros((n_pad, 1), jnp.float32).at[:n].set(f2)
            lbl_c = jnp.zeros((n_pad, 1), jnp.float32).at[:n].set(label)
            valid = (jnp.arange(n_pad) < n).astype(jnp.float32)
            extra = (valid.reshape(n_pad, 1), valid.reshape(1, n_pad))
        else:
            feat_p, f2_c, lbl_c = feature, f2, label
            extra = ()
        f2_r = f2_c.reshape(1, n_pad)
        lbl_r = lbl_c.reshape(1, n_pad)

        w_diff, w, rowsum = pairs_call(feat_p, feat_p, f2_c, f2_r,
                                       lbl_c, lbl_r, *extra)

        mean_diff = jnp.sum(rowsum) * inv_nn
        alpha = jnp.where(state[1] > 0.5,
                          pf * state[0] + (1.0 - pf) * mean_diff,
                          mean_diff)

        cnt, num, den = mask_call(alpha.reshape(1), w_diff, w)

        loss = jnp.sum(num) / (jnp.sum(den) + 1e-9)
        nonz = jnp.sum(cnt)
        new_state = jnp.stack([alpha, jnp.ones((), jnp.float32)])
        return loss, nonz, alpha, mean_diff, new_state

    return jax.jit(run)


class RegMetricLoss:
    """JAX/Pallas port of the PyTorch RegMetricLoss module (forward only).

    The running EMA threshold `alpha` stays a device scalar between calls
    (no per-step host round trip); returned values are device scalars.
    """

    def __init__(self, sigma=1.0, w_leak=0.2, p=0.9, tile=512):
        self.sigma = float(sigma)
        self.w_leak = float(w_leak)
        self.p = float(p)
        self.tile = int(tile)
        self.alpha = None                              # device scalar after 1st call
        self._state = jnp.zeros((2,), jnp.float32)     # [alpha, has_prev]

    def __call__(self, feature, label):
        feature = jnp.asarray(feature, jnp.float32)
        label = jnp.asarray(label, jnp.float32)
        if label.ndim == 1:
            label = label.reshape(-1, 1)
        if label.shape[-1] != 1:
            # TODO(synk): multi-dimensional labels would need a gram-based
            # label-distance path; this port covers the scalar-label case.
            raise NotImplementedError("Pallas RegMetricLoss expects scalar labels")
        n, d = feature.shape
        fn = _build_rml_call(n, d, self.sigma, self.w_leak, self.p, self.tile)
        loss, nonz, alpha, mean_diff, self._state = fn(self._state, feature, label)
        self.alpha = alpha
        return loss, nonz, alpha, mean_diff


# ------------------------- pure-JAX reference ------------------------------ #
def _ref_forward(feature, label, sigma, w_leak, p, alpha_prev):
    feature = jnp.asarray(feature, jnp.float32)
    label = jnp.asarray(label, jnp.float32)
    if label.ndim == 1:
        label = label.reshape(-1, 1)
    f2 = jnp.sum(feature ** 2, axis=1)
    f_dist = f2[None, :] + f2[:, None] - 2.0 * feature @ feature.T
    f_dist = jnp.sqrt(jnp.maximum(f_dist, 0.0))
    l2 = jnp.sum(label ** 2, axis=1, keepdims=True)
    l_dist = l2 + l2.T - 2.0 * label @ label.T
    l_dist = jnp.sqrt(jnp.maximum(l_dist, 1e-12))
    w = jnp.exp(-((l_dist / sigma) ** 2) / 2.0) + w_leak
    diff = jnp.abs(f_dist - l_dist)
    w_diff = w * diff
    mean_diff = jnp.mean(w_diff)
    if alpha_prev is None:
        alpha = mean_diff
    else:
        alpha = p * alpha_prev + (1 - p) * mean_diff
    mask = w_diff > alpha
    nonz = jnp.sum(mask.astype(jnp.float32))
    loss = jnp.sum(jnp.where(mask, w_diff, 0.0)) / (
        jnp.sum(jnp.where(mask, w, 0.0)) + 1e-9)
    return float(loss), float(nonz), float(alpha), float(mean_diff)


if __name__ == "__main__":
    key = jax.random.PRNGKey(0)
    kf, kl, kf2, kl2 = jax.random.split(key, 4)

    # ---- test 1: single-tile path (N=8, D=32), two calls (EMA branch) ----
    N, D = 8, 32
    feature = jax.random.normal(kf, (N, D), jnp.float32)
    label = jax.random.uniform(kl, (N,), jnp.float32) * 3.0

    mod = RegMetricLoss(sigma=1.0, w_leak=0.2, p=0.9)

    loss1, nonz1, alpha1, mdiff1 = mod(feature, label)
    jax.block_until_ready(loss1)
    r_loss1, r_nonz1, r_alpha1, r_mdiff1 = _ref_forward(
        feature, label, 1.0, 0.2, 0.9, None)
    assert np.allclose(float(loss1), r_loss1, rtol=1e-3, atol=1e-4)
    assert np.allclose(float(nonz1), r_nonz1, rtol=0, atol=0.5)
    assert np.allclose(float(mdiff1), r_mdiff1, rtol=1e-3, atol=1e-5)

    loss2, nonz2, alpha2, mdiff2 = mod(feature * 1.05, label)
    jax.block_until_ready(loss2)
    r_loss2, r_nonz2, r_alpha2, r_mdiff2 = _ref_forward(
        feature * 1.05, label, 1.0, 0.2, 0.9, r_alpha1)
    assert np.allclose(float(loss2), r_loss2, rtol=1e-3, atol=1e-4)
    assert np.allclose(float(alpha2), r_alpha2, rtol=1e-3, atol=1e-5)

    # ---- test 2: multi-tile + padding/mask path (N=300 -> 3x3 tiles of 128) ----
    N2, D2 = 300, 40
    feature2 = jax.random.normal(kf2, (N2, D2), jnp.float32)
    label2 = jax.random.uniform(kl2, (N2,), jnp.float32) * 5.0
    r_loss3, r_nonz3, r_alpha3, r_mdiff3 = _ref_forward(
        feature2, label2, 1.0, 0.2, 0.9, None)

    mod2 = RegMetricLoss(sigma=1.0, w_leak=0.2, p=0.9, tile=128)
    loss3, nonz3, alpha3, mdiff3 = mod2(feature2, label2)
    jax.block_until_ready(loss3)
    assert np.allclose(float(mdiff3), r_mdiff3, rtol=1e-3, atol=1e-5)
    assert np.allclose(float(alpha3), r_alpha3, rtol=1e-3, atol=1e-5)
    assert np.allclose(float(loss3), r_loss3, rtol=5e-3, atol=1e-3)
    assert np.allclose(float(nonz3), r_nonz3, rtol=1e-3, atol=3.0)

    # ---- test 3: default tile (512) -> single padded 304x304 tile ----
    mod3 = RegMetricLoss(sigma=1.0, w_leak=0.2, p=0.9)
    loss4, nonz4, alpha4, mdiff4 = mod3(feature2, label2)
    jax.block_until_ready(loss4)
    assert np.allclose(float(mdiff4), r_mdiff3, rtol=1e-3, atol=1e-5)
    assert np.allclose(float(loss4), r_loss3, rtol=5e-3, atol=1e-3)
    assert np.allclose(float(nonz4), r_nonz3, rtol=1e-3, atol=3.0)

    print("KERNEL_OK")
</pallas_src>

<mosaic_0001>
module attributes {stable_mosaic.version = 11 : i64} {
  func.func @_pairs_kernel(%arg0: i32, %arg1: i32, %arg2: memref<8x32xf32, #tpu.memory_space<vmem>>, %arg3: memref<8x32xf32, #tpu.memory_space<vmem>>, %arg4: memref<8x1xf32, #tpu.memory_space<vmem>>, %arg5: memref<1x8xf32, #tpu.memory_space<vmem>>, %arg6: memref<8x1xf32, #tpu.memory_space<vmem>>, %arg7: memref<1x8xf32, #tpu.memory_space<vmem>>, %arg8: memref<8x8xf32, #tpu.memory_space<vmem>>, %arg9: memref<8x8xf32, #tpu.memory_space<vmem>>, %arg10: memref<8x1xf32, #tpu.memory_space<vmem>>) attributes {dimension_semantics = [#tpu.dimension_semantics<parallel>, #tpu.dimension_semantics<arbitrary>], iteration_bounds = array<i64: 1, 1>, scalar_prefetch = 0 : i64, scratch_operands = 0 : i64, tpu.core_type = #tpu.core_type<tc>, window_params = [{transform_indices = @transform_0, window_bounds = array<i64: 8, 32>}, {transform_indices = @transform_1, window_bounds = array<i64: 8, 32>}, {transform_indices = @transform_2, window_bounds = array<i64: 8, 1>}, {transform_indices = @transform_3, window_bounds = array<i64: 1, 8>}, {transform_indices = @transform_4, window_bounds = array<i64: 8, 1>}, {transform_indices = @transform_5, window_bounds = array<i64: 1, 8>}, {transform_indices = @transform_6, window_bounds = array<i64: 8, 8>}, {transform_indices = @transform_7, window_bounds = array<i64: 8, 8>}, {transform_indices = @transform_8, window_bounds = array<i64: 8, 1>}]} {
    %c0 = arith.constant 0 : index
    %c0_0 = arith.constant 0 : index
    %0 = vector.load %arg2[%c0, %c0_0] : memref<8x32xf32, #tpu.memory_space<vmem>>, vector<8x32xf32>
    %c0_1 = arith.constant 0 : index
    %c0_2 = arith.constant 0 : index
    %1 = vector.load %arg3[%c0_1, %c0_2] : memref<8x32xf32, #tpu.memory_space<vmem>>, vector<8x32xf32>
    %cst = arith.constant dense<0.000000e+00> : vector<8x8xf32>
    %2 = tpu.matmul %0, %1, %cst {dimension_numbers = #tpu.dot_dimension_numbers<[1], [1], [0], [0], [0, 0, 1, 0], [], []>} : vector<8x32xf32>, vector<8x32xf32>, vector<8x8xf32> -> vector<8x8xf32>
    %c0_3 = arith.constant 0 : index
    %c0_4 = arith.constant 0 : index
    %3 = vector.load %arg4[%c0_3, %c0_4] : memref<8x1xf32, #tpu.memory_space<vmem>>, vector<8x1xf32>
    %c0_5 = arith.constant 0 : index
    %c0_6 = arith.constant 0 : index
    %4 = vector.load %arg5[%c0_5, %c0_6] : memref<1x8xf32, #tpu.memory_space<vmem>>, vector<1x8xf32>
    %5 = vector.broadcast %3 : vector<8x1xf32> to vector<8x8xf32>
    %6 = vector.broadcast %4 : vector<1x8xf32> to vector<8x8xf32>
    %7 = arith.addf %5, %6 : vector<8x8xf32>
    %cst_7 = arith.constant 2.000000e+00 : f32
    %8 = vector.broadcast %cst_7 : f32 to vector<8x8xf32>
    %9 = arith.mulf %8, %2 : vector<8x8xf32>
    %10 = arith.subf %7, %9 : vector<8x8xf32>
    %cst_8 = arith.constant 0.000000e+00 : f32
    %11 = vector.broadcast %cst_8 : f32 to vector<8x8xf32>
    %12 = arith.maximumf %10, %11 : vector<8x8xf32>
    %13 = math.sqrt %12 : vector<8x8xf32>
    %c0_9 = arith.constant 0 : index
    %c0_10 = arith.constant 0 : index
    %14 = vector.load %arg6[%c0_9, %c0_10] : memref<8x1xf32, #tpu.memory_space<vmem>>, vector<8x1xf32>
    %c0_11 = arith.constant 0 : index
    %c0_12 = arith.constant 0 : index
    %15 = vector.load %arg7[%c0_11, %c0_12] : memref<1x8xf32, #tpu.memory_space<vmem>>, vector<1x8xf32>
    %16 = vector.broadcast %14 : vector<8x1xf32> to vector<8x8xf32>
    %17 = vector.broadcast %15 : vector<1x8xf32> to vector<8x8xf32>
    %18 = arith.subf %16, %17 : vector<8x8xf32>
    %19 = math.absf %18 : vector<8x8xf32>
    %cst_13 = arith.constant 9.99999997E-7 : f32
    %20 = vector.broadcast %cst_13 : f32 to vector<8x8xf32>
    %21 = arith.maximumf %19, %20 : vector<8x8xf32>
    %22 = arith.mulf %21, %21 : vector<8x8xf32>
    %cst_14 = arith.constant -5.000000e-01 : f32
    %23 = vector.broadcast %cst_14 : f32 to vector<8x8xf32>
    %24 = arith.mulf %23, %22 : vector<8x8xf32>
    %25 = math.exp %24 : vector<8x8xf32>
    %cst_15 = arith.constant 2.000000e-01 : f32
    %26 = vector.broadcast %cst_15 : f32 to vector<8x8xf32>
    %27 = arith.addf %25, %26 : vector<8x8xf32>
    %28 = arith.subf %13, %21 : vector<8x8xf32>
    %29 = math.absf %28 : vector<8x8xf32>
    %30 = arith.mulf %27, %29 : vector<8x8xf32>
    %c0_16 = arith.constant 0 : index
    %c0_17 = arith.constant 0 : index
    %31 = vector.load %arg8[%c0_16, %c0_17] : memref<8x8xf32, #tpu.memory_space<vmem>>, vector<8x8xf32>
    tpu.vector_store %arg8[%c0_16, %c0_17], %30 {strides = array<i32>} : memref<8x8xf32, #tpu.memory_space<vmem>>, vector<8x8xf32>,
    %c0_18 = arith.constant 0 : index
    %c0_19 = arith.constant 0 : index
    %32 = vector.load %arg9[%c0_18, %c0_19] : memref<8x8xf32, #tpu.memory_space<vmem>>, vector<8x8xf32>
    tpu.vector_store %arg9[%c0_18, %c0_19], %27 {strides = array<i32>} : memref<8x8xf32, #tpu.memory_space<vmem>>, vector<8x8xf32>,
    %c0_i32 = arith.constant 0 : i32
    %33 = arith.cmpi eq, %arg1, %c0_i32 : i32
    %34 = arith.extui %33 : i1 to i32
    %c0_i32_20 = arith.constant 0 : i32
    %35 = arith.cmpi ne, %34, %c0_i32_20 : i32
    scf.if %35 {
      %cst_26 = arith.constant 0.000000e+00 : f32
      %41 = vector.broadcast %cst_26 : f32 to vector<8x1xf32>
      %c0_27 = arith.constant 0 : index
      %c0_28 = arith.constant 0 : index
      %42 = vector.load %arg10[%c0_27, %c0_28] : memref<8x1xf32, #tpu.memory_space<vmem>>, vector<8x1xf32>
      tpu.vector_store %arg10[%c0_27, %c0_28], %41 {strides = array<i32>} : memref<8x1xf32, #tpu.memory_space<vmem>>, vector<8x1xf32>,
    } else {
    }
    %c0_21 = arith.constant 0 : index
    %c0_22 = arith.constant 0 : index
    %36 = vector.load %arg10[%c0_21, %c0_22] : memref<8x1xf32, #tpu.memory_space<vmem>>, vector<8x1xf32>
    %cst_23 = arith.constant dense<0.000000e+00> : vector<8xf32>
    %37 = vector.multi_reduction <add>, %30, %cst_23 [1] : vector<8x8xf32> to vector<8xf32>
    %38 = vector.shape_cast %37 : vector<8xf32> to vector<8x1xf32>
    %39 = arith.addf %36, %38 : vector<8x1xf32>
    %c0_24 = arith.constant 0 : index
    %c0_25 = arith.constant 0 : index
    %40 = vector.load %arg10[%c0_24, %c0_25] : memref<8x1xf32, #tpu.memory_space<vmem>>, vector<8x1xf32>
    tpu.vector_store %arg10[%c0_24, %c0_25], %39 {strides = array<i32>} : memref<8x1xf32, #tpu.memory_space<vmem>>, vector<8x1xf32>,
    return
  }
  func.func @transform_0(%arg0: i32, %arg1: i32) -> (i32, i32) {
    %c0_i32 = arith.constant 0 : i32
    %c0_i32_0 = arith.constant 0 : i32
    return %arg0, %c0_i32 : i32, i32
  }
  func.func @transform_1(%arg0: i32, %arg1: i32) -> (i32, i32) {
    %c0_i32 = arith.constant 0 : i32
    %c0_i32_0 = arith.constant 0 : i32
    return %arg1, %c0_i32 : i32, i32
  }
  func.func @transform_2(%arg0: i32, %arg1: i32) -> (i32, i32) {
    %c0_i32 = arith.constant 0 : i32
    %c0_i32_0 = arith.constant 0 : i32
    return %arg0, %c0_i32 : i32, i32
  }
  func.func @transform_3(%arg0: i32, %arg1: i32) -> (i32, i32) {
    %c0_i32 = arith.constant 0 : i32
    %c0_i32_0 = arith.constant 0 : i32
    return %c0_i32, %arg1 : i32, i32
  }
  func.func @transform_4(%arg0: i32, %arg1: i32) -> (i32, i32) {
    %c0_i32 = arith.constant 0 : i32
    %c0_i32_0 = arith.constant 0 : i32
    return %arg0, %c0_i32 : i32, i32
  }
  func.func @transform_5(%arg0: i32, %arg1: i32) -> (i32, i32) {
    %c0_i32 = arith.constant 0 : i32
    %c0_i32_0 = arith.constant 0 : i32
    return %c0_i32, %arg1 : i32, i32
  }
  func.func @transform_6(%arg0: i32, %arg1: i32) -> (i32, i32) {
    %c0_i32 = arith.constant 0 : i32
    return %arg0, %arg1 : i32, i32
  }
  func.func @transform_7(%arg0: i32, %arg1: i32) -> (i32, i32) {
    %c0_i32 = arith.constant 0 : i32
    return %arg0, %arg1 : i32, i32
  }
  func.func @transform_8(%arg0: i32, %arg1: i32) -> (i32, i32) {
    %c0_i32 = arith.constant 0 : i32
    %c0_i32_0 = arith.constant 0 : i32
    return %arg0, %c0_i32 : i32, i32
  }
}

module attributes {stable_mosaic.version = 11 : i64} {
  func.func @_mask_kernel(%arg0: i32, %arg1: i32, %arg2: memref<1xf32, #tpu.memory_space<smem>>, %arg3: memref<8x8xf32, #tpu.memory_space<vmem>>, %arg4: memref<8x8xf32, #tpu.memory_space<vmem>>, %arg5: memref<8x1xf32, #tpu.memory_space<vmem>>, %arg6: memref<8x1xf32, #tpu.memory_space<vmem>>, %arg7: memref<8x1xf32, #tpu.memory_space<vmem>>) attributes {dimension_semantics = [#tpu.dimension_semantics<parallel>, #tpu.dimension_semantics<arbitrary>], iteration_bounds = array<i64: 1, 1>, scalar_prefetch = 1 : i64, scratch_operands = 0 : i64, tpu.core_type = #tpu.core_type<tc>, window_params = [{transform_indices = @transform_0, window_bounds = array<i64: 8, 8>}, {transform_indices = @transform_1, window_bounds = array<i64: 8, 8>}, {transform_indices = @transform_2, window_bounds = array<i64: 8, 1>}, {transform_indices = @transform_3, window_bounds = array<i64: 8, 1>}, {transform_indices = @transform_4, window_bounds = array<i64: 8, 1>}]} {
    %c0_i32 = arith.constant 0 : i32
    %0 = arith.cmpi eq, %arg1, %c0_i32 : i32
    %1 = arith.extui %0 : i1 to i32
    %c0_i32_0 = arith.constant 0 : i32
    %2 = arith.cmpi ne, %1, %c0_i32_0 : i32
    scf.if %2 {
      %cst_19 = arith.constant 0.000000e+00 : f32
      %27 = vector.broadcast %cst_19 : f32 to vector<8x1xf32>
      %c0_20 = arith.constant 0 : index
      %c0_21 = arith.constant 0 : index
      %28 = vector.load %arg5[%c0_20, %c0_21] : memref<8x1xf32, #tpu.memory_space<vmem>>, vector<8x1xf32>
      tpu.vector_store %arg5[%c0_20, %c0_21], %27 {strides = array<i32>} : memref<8x1xf32, #tpu.memory_space<vmem>>, vector<8x1xf32>,
      %cst_22 = arith.constant 0.000000e+00 : f32
      %29 = vector.broadcast %cst_22 : f32 to vector<8x1xf32>
      %c0_23 = arith.constant 0 : index
      %c0_24 = arith.constant 0 : index
      %30 = vector.load %arg6[%c0_23, %c0_24] : memref<8x1xf32, #tpu.memory_space<vmem>>, vector<8x1xf32>
      tpu.vector_store %arg6[%c0_23, %c0_24], %29 {strides = array<i32>} : memref<8x1xf32, #tpu.memory_space<vmem>>, vector<8x1xf32>,
      %cst_25 = arith.constant 0.000000e+00 : f32
      %31 = vector.broadcast %cst_25 : f32 to vector<8x1xf32>
      %c0_26 = arith.constant 0 : index
      %c0_27 = arith.constant 0 : index
      %32 = vector.load %arg7[%c0_26, %c0_27] : memref<8x1xf32, #tpu.memory_space<vmem>>, vector<8x1xf32>
      tpu.vector_store %arg7[%c0_26, %c0_27], %31 {strides = array<i32>} : memref<8x1xf32, #tpu.memory_space<vmem>>, vector<8x1xf32>,
    } else {
    }
    %c0 = arith.constant 0 : index
    %c0_1 = arith.constant 0 : index
    %3 = vector.load %arg3[%c0, %c0_1] : memref<8x8xf32, #tpu.memory_space<vmem>>, vector<8x8xf32>
    %c0_2 = arith.constant 0 : index
    %c0_3 = arith.constant 0 : index
    %4 = vector.load %arg4[%c0_2, %c0_3] : memref<8x8xf32, #tpu.memory_space<vmem>>, vector<8x8xf32>
    %c0_4 = arith.constant 0 : index
    %5 = memref.load %arg2[%c0_4] : memref<1xf32, #tpu.memory_space<smem>>
    %6 = vector.broadcast %5 : f32 to vector<8x8xf32>
    %7 = arith.cmpf ogt, %3, %6 : vector<8x8xf32>
    %8 = arith.extui %7 : vector<8x8xi1> to vector<8x8xi32>
    %9 = arith.sitofp %8 : vector<8x8xi32> to vector<8x8xf32>
    %c0_5 = arith.constant 0 : index
    %c0_6 = arith.constant 0 : index
    %10 = vector.load %arg5[%c0_5, %c0_6] : memref<8x1xf32, #tpu.memory_space<vmem>>, vector<8x1xf32>
    %cst = arith.constant dense<0.000000e+00> : vector<8xf32>
    %11 = vector.multi_reduction <add>, %9, %cst [1] : vector<8x8xf32> to vector<8xf32>
    %12 = vector.shape_cast %11 : vector<8xf32> to vector<8x1xf32>
    %13 = arith.addf %10, %12 : vector<8x1xf32>
    %c0_7 = arith.constant 0 : index
    %c0_8 = arith.constant 0 : index
    %14 = vector.load %arg5[%c0_7, %c0_8] : memref<8x1xf32, #tpu.memory_space<vmem>>, vector<8x1xf32>
    tpu.vector_store %arg5[%c0_7, %c0_8], %13 {strides = array<i32>} : memref<8x1xf32, #tpu.memory_space<vmem>>, vector<8x1xf32>,
    %c0_9 = arith.constant 0 : index
    %c0_10 = arith.constant 0 : index
    %15 = vector.load %arg6[%c0_9, %c0_10] : memref<8x1xf32, #tpu.memory_space<vmem>>, vector<8x1xf32>
    %16 = arith.mulf %3, %9 : vector<8x8xf32>
    %cst_11 = arith.constant dense<0.000000e+00> : vector<8xf32>
    %17 = vector.multi_reduction <add>, %16, %cst_11 [1] : vector<8x8xf32> to vector<8xf32>
    %18 = vector.shape_cast %17 : vector<8xf32> to vector<8x1xf32>
    %19 = arith.addf %15, %18 : vector<8x1xf32>
    %c0_12 = arith.constant 0 : index
    %c0_13 = arith.constant 0 : index
    %20 = vector.load %arg6[%c0_12, %c0_13] : memref<8x1xf32, #tpu.memory_space<vmem>>, vector<8x1xf32>
    tpu.vector_store %arg6[%c0_12, %c0_13], %19 {strides = array<i32>} : memref<8x1xf32, #tpu.memory_space<vmem>>, vector<8x1xf32>,
    %c0_14 = arith.constant 0 : index
    %c0_15 = arith.constant 0 : index
    %21 = vector.load %arg7[%c0_14, %c0_15] : memref<8x1xf32, #tpu.memory_space<vmem>>, vector<8x1xf32>
    %22 = arith.mulf %4, %9 : vector<8x8xf32>
    %cst_16 = arith.constant dense<0.000000e+00> : vector<8xf32>
    %23 = vector.multi_reduction <add>, %22, %cst_16 [1] : vector<8x8xf32> to vector<8xf32>
    %24 = vector.shape_cast %23 : vector<8xf32> to vector<8x1xf32>
    %25 = arith.addf %21, %24 : vector<8x1xf32>
    %c0_17 = arith.constant 0 : index
    %c0_18 = arith.constant 0 : index
    %26 = vector.load %arg7[%c0_17, %c0_18] : memref<8x1xf32, #tpu.memory_space<vmem>>, vector<8x1xf32>
    tpu.vector_store %arg7[%c0_17, %c0_18], %25 {strides = array<i32>} : memref<8x1xf32, #tpu.memory_space<vmem>>, vector<8x1xf32>,
    return
  }
  func.func @transform_0(%arg0: i32, %arg1: i32, %arg2: memref<1xf32, #tpu.memory_space<smem>>) -> (i32, i32) {
    %c0_i32 = arith.constant 0 : i32
    return %arg0, %arg1 : i32, i32
  }
  func.func @transform_1(%arg0: i32, %arg1: i32, %arg2: memref<1xf32, #tpu.memory_space<smem>>) -> (i32, i32) {
    %c0_i32 = arith.constant 0 : i32
    return %arg0, %arg1 : i32, i32
  }
  func.func @transform_2(%arg0: i32, %arg1: i32, %arg2: memref<1xf32, #tpu.memory_space<smem>>) -> (i32, i32) {
    %c0_i32 = arith.constant 0 : i32
    %c0_i32_0 = arith.constant 0 : i32
    return %arg0, %c0_i32 : i32, i32
  }
  func.func @transform_3(%arg0: i32, %arg1: i32, %arg2: memref<1xf32, #tpu.memory_space<smem>>) -> (i32, i32) {
    %c0_i32 = arith.constant 0 : i32
    %c0_i32_0 = arith.constant 0 : i32
    return %arg0, %c0_i32 : i32, i32
  }
  func.func @transform_4(%arg0: i32, %arg1: i32, %arg2: memref<1xf32, #tpu.memory_space<smem>>) -> (i32, i32) {
    %c0_i32 = arith.constant 0 : i32
    %c0_i32_0 = arith.constant 0 : i32
    return %arg0, %c0_i32 : i32, i32
  }
}

</mosaic_0001>

<bundles_post_ra>
// kernel: run.2
= control target key start
LH: loop header
LB: loop body
LE: loop exit
PB: predicated region body
PF: predicated region fallthrough
CT: control target
= control target key end

     0   :  { %vm28_vm0 = vcmask 261120   ;;  %v200_v0 = vmov 0.0   ;;  %vm201_vm1 = vmmov 0   ;;  %v202_v4 = vmov 0   ;;  %s288_s1 = inlined_call_operand.vmem [shape: f32[8,32], index: 1, kind: input, shape index: {}, may-alias: {0,1}]   ;;  %s289_s0 = inlined_call_operand.vmem [shape: f32[8,32], index: 0, kind: input, shape index: {}, may-alias: {0,1}]   ;;  %s290_s2 = inlined_call_operand.vmem [shape: f32[8,1], index: 2, kind: input, shape index: {}]   ;;  %s291_s4 = inlined_call_operand.vmem [shape: f32[8,1], index: 4, kind: input, shape index: {}]   ;;  %s292_s8 = inlined_call_operand.vmem [shape: f32[8,1], index: 8, kind: output, shape index: {2}]   ;;  %s293_s5 = inlined_call_operand.vmem [shape: f32[1,8], index: 5, kind: input, shape index: {}]   ;;  %s294_s7 = inlined_call_operand.vmem [shape: f32[8,8], index: 7, kind: output, shape index: {1}]   ;;  %s295_s3 = inlined_call_operand.vmem [shape: f32[1,8], index: 3, kind: input, shape index: {}]   ;;  %s296_s6 = inlined_call_operand.vmem [shape: f32[8,8], index: 6, kind: output, shape index: {0}]  }
   0x1   :  { %187 = vmatprep.subr.mxu0 %v200_v0  ;;  %v27_v1 = vld [vmem:[%s288_s1] sm:$0xff]  ;;  %189 = vmatprep.mubr.msk.f32.mxu0 %vm201_vm1, %v200_v0  ;;  %vm160_vm2 = vcmask 7168   ;;  %vm153_vm3 = vcmask 64512  }
   0x2   :  { %v105_v2 = vld [vmem:[%s290_s2] sm:$0xff]  ;;  %188 = vmatpush3.xpose.msk.msra.mxu0 %vm28_vm0, %v27_v1  ;;  %195 = vset.pattern.permute.xlu0 %v202_v4  ;;  %161 = vst.msk [vmem:[%s292_s8] sm:$0xff] %vm160_vm2, %v200_v0 }
   0x3   :  { %v26_v3 = vld [vmem:[%s289_s0] sm:$0xff]  ;;  %109 = vperm.xlu0 %195, %v105_v2  }
   0x4   :  { %v129_v5 = vld [vmem:[%s291_s4] sm:$0xff] }
   0x5   :  { %190 = vmatmul.mubr.msk.f32.vlgmr.msra.gmra.mrb[0].mxu0 %vm28_vm0, %v26_v3  ;;  %v184_v7 = vld [vmem:[%s293_s5] ss:$0 sm:$0xff] }
   0x6   :  { %v183_v17 = vld [vmem:[%s295_s3] ss:$0 sm:$0xff] }
   0x7   :  { %133 = vperm.xlu0 %195, %v129_v5  }
   0x9   :  { %v162_v33 = vld [vmem:[%s292_s8] sm:$0xff] }
  0x82   :  { %v110_v6 = vpop.permute.xlu0 %109 }
  0x83   :  { %v118_v19 = vadd.f32 %v183_v17, %v110_v6 }
  0x86   :  { %v134_v8 = vpop.permute.xlu0 %133 }
  0x87   :  { %v142_v9 = vsub.f32 %v134_v8, %v184_v7 }
  0x89   :  { %v143_v10 = vand.u32 2147483647, %v142_v9 }
  0x8b   :  { %v144_v11 = vmax.f32 %v143_v10, 1e-06 }
  0x8d   :  { %v145_v12 = vmul.f32 %v144_v11, %v144_v11 }
  0x8f   :  { %v146_v13 = vmul.f32 -0.5, %v145_v12 }
  0x91   :  { %v147_v14 = vmul.f32 1.442695, %v146_v13 }
  0x93   :  { %196 = vpow2.f32 %v147_v14 }
  0x9d   :  { %v197_v15 = vpop.eup %196 }
  0x9e   :  { %v149_v16 = vadd.f32 0.2, %v197_v15 }
  0xa0   :  { %155 = vst.msk [vmem:[%s294_s7] sm:$0xff] %vm153_vm3, %v149_v16 }
  0xd8   :  { %v101_v18 = vpop.f32.mrb[0].mxu0 }
  0xd9   :  { %v119_v20 = vmul.f32 2.0, %v101_v18  ;;  %v191_v21 = vpop.f32.mrb[1].mxu0 }
  0xdb   :  { %v120_v22 = vsub.f32 %v118_v19, %v119_v20 }
  0xdd   :  { %v121_v23 = vmax.f32 %v120_v22, 0.0 }
  0xdf   :  { %198 = vrsqrt.f32 %v121_v23  ;;  %vm124_vm4 = vcmp.eq.f32.partialorder %v121_v23, inf  ;;  %v127_v26 = vand.u32 2147483648, %v121_v23  ;;  %vm126_vm5 = vcmp.eq.f32.partialorder %v121_v23, 0.0 }
  0xe9   :  { %v199_v24 = vpop.eup %198 }
  0xea   :  { %v123_v25 = vmul.f32 %v199_v24, %v121_v23 }
  0xec   :  { %v125_v27 = vsel %vm124_vm4, %v121_v23, %v123_v25 }
  0xed   :  { %v128_v28 = vsel %vm126_vm5, %v127_v26, %v125_v27 }
  0xee   :  { %v150_v29 = vsub.f32 %v128_v28, %v144_v11 }
  0xf0   :  { %v151_v30 = vand.u32 2147483647, %v150_v29 }
  0xf2   :  { %v152_v31 = vmul.f32 %v151_v30, %v149_v16 }
  0xf4   :  { %v163_v32 = vsel %vm153_vm3, %v152_v31, 0.0  ;;  %154 = vst.msk [vmem:[%s296_s6] sm:$0xff] %vm153_vm3, %v152_v31 }
  0xf5   :  { %164 = vadd.xlane.f32.xlu1 %v163_v32 }
 0x182   :  { %v165_v34 = vpop.xlane.xlu1 %164 }
 0x183   :  { %v166_v35 = vadd.f32 %v165_v34, %v162_v33 }
 0x185   :  { %168 = vst.msk [vmem:[%s292_s8] sm:$0xff] %vm160_vm2, %v166_v35 }

// kernel: run.3
= control target key start
LH: loop header
LB: loop body
LE: loop exit
PB: predicated region body
PF: predicated region fallthrough
CT: control target
= control target key end

     0   :  { %vm20_vm0 = vcmask 7168   ;;  %vm32_vm1 = vcmask 64512   ;;  %v67_v3 = vmov 0.0   ;;  %s140_s0 = inlined_call_operand.<no memory space> [shape: f32[1], index: 0, kind: input, shape index: {}]   ;;  %s141_s1 = inlined_call_operand.vmem [shape: f32[8,8], index: 1, kind: input, shape index: {}]   ;;  %s142_s2 = inlined_call_operand.vmem [shape: f32[8,8], index: 2, kind: input, shape index: {}]   ;;  %s143_s3 = inlined_call_operand.vmem [shape: f32[8,1], index: 3, kind: output, shape index: {0}]   ;;  %s144_s5 = inlined_call_operand.vmem [shape: f32[8,1], index: 5, kind: output, shape index: {2}]   ;;  %s145_s4 = inlined_call_operand.vmem [shape: f32[8,1], index: 4, kind: output, shape index: {1}]  }
   0x1   :  { %v24_v0 = vld [vmem:[%s141_s1] sm:$0xff]  ;;  %v27_v1 = vstv %s140_s0  ;;  %21 = vst.msk [vmem:[%s143_s3] sm:$0xff] %vm20_vm0, %v67_v3  ;;  %23 = vst.msk [vmem:[%s144_s5] sm:$0xff] %vm20_vm0, %v67_v3 }
   0x2   :  { %v25_v2 = vld [vmem:[%s142_s2] sm:$0xff]  ;;  %vm28_vm2 = vcmp.gt.f32.partialorder %v24_v0, %v27_v1  ;;  %22 = vst.msk [vmem:[%s145_s4] sm:$0xff] %vm20_vm0, %v67_v3 }
   0x3   :  { %v65_v4 = vsel %vm28_vm2, 1.0, %v67_v3 }
   0x4   :  { %v33_v5 = vsel %vm32_vm1, %v65_v4, 0.0  ;;  %v47_v6 = vmul.f32 %v65_v4, %v25_v2  ;;  %v40_v7 = vmul.f32 %v65_v4, %v24_v0 }
   0x5   :  { %34 = vadd.xlane.f32.xlu0 %v33_v5 }
   0x6   :  { %v48_v8 = vsel %vm32_vm1, %v47_v6, 0.0  ;;  %v41_v9 = vsel %vm32_vm1, %v40_v7, 0.0 }
   0x7   :  { %49 = vadd.xlane.f32.xlu1 %v48_v8 }
   0x8   :  { %v31_v10 = vld [vmem:[%s143_s3] sm:$0xff] }
   0x9   :  { %42 = vadd.xlane.f32.xlu0 %v41_v9  ;;  %v46_v12 = vld [vmem:[%s144_s5] sm:$0xff] }
   0xa   :  { %v39_v15 = vld [vmem:[%s145_s4] sm:$0xff] }
  0x92   :  { %v35_v11 = vpop.xlane.xlu0 %34 }
  0x93   :  { %v36_v13 = vadd.f32 %v35_v11, %v31_v10 }
  0x94   :  { %v50_v14 = vpop.xlane.xlu1 %49 }
  0x95   :  { %38 = vst.msk [vmem:[%s143_s3] sm:$0xff] %vm20_vm0, %v36_v13  ;;  %v51_v16 = vadd.f32 %v50_v14, %v46_v12 }
  0x96   :  { %v43_v17 = vpop.xlane.xlu0 %42 }
  0x97   :  { %52 = vst.msk [vmem:[%s144_s5] sm:$0xff] %vm20_vm0, %v51_v16  ;;  %v44_v18 = vadd.f32 %v43_v17, %v39_v15 }
  0x99   :  { %45 = vst.msk [vmem:[%s145_s4] sm:$0xff] %vm20_vm0, %v44_v18 }

</bundles_post_ra>
